<compile_context>
chip_gen: v5e
topology: v5e:2x2
jax: 0.10.0
libtpu: 0.0.40
codegen_flags: <defaults>
</compile_context>

<pallas_src>
import jax
import jax.numpy as jnp
import numpy as np
from jax.experimental import pallas as pl
from jax.experimental.pallas import tpu as pltpu

EPS = 1e-5


def reduction_fc_kernel(x_ref, w_ref, gb_ref, fcw_ref, reduce_ref, fc_ref):
    k = pl.program_id(1)
    tk = w_ref.shape[0]

    @pl.when(k == 0)
    def _init():
        reduce_ref[...] = jnp.zeros_like(reduce_ref)

    # 1x1 conv (bias=False) == channel matmul. Weights pre-transposed to (Cin, Cout),
    # bf16 operands, f32 MXU accumulation directly into the resident `reduce` block.
    # x is resident; take the k-th lane-aligned slice of the Cin axis.
    start = pl.multiple_of(k * tk, 128)
    reduce_ref[...] += jnp.dot(x_ref[:, pl.ds(start, tk)], w_ref[...],
                               preferred_element_type=jnp.float32)

    @pl.when(k == pl.num_programs(1) - 1)
    def _finalize():
        y = reduce_ref[...]                                   # (B, tcout) f32 conv out
        inv_b = 1.0 / y.shape[0]
        # Training-mode batch stats (biased), centered two-pass variance (f32).
        mean = jnp.sum(y, axis=0, keepdims=True) * inv_b
        d = y - mean
        var = jnp.sum(d * d, axis=0, keepdims=True) * inv_b
        # BN folded to per-channel scale (gamma row 0, beta row 1); rsqrt on the EUP.
        scale = gb_ref[0:1, :] * jax.lax.rsqrt(var + EPS)
        r = jnp.maximum(d * scale + gb_ref[1:2, :], 0.0)      # BN + ReLU on the VPU
        reduce_ref[...] = r
        # Linear(feat_out, num_classes, bias=False): partial over this Cout tile.
        fc_ref[...] = jnp.dot(r.astype(fcw_ref.dtype), fcw_ref[...],
                              preferred_element_type=jnp.float32)


def _round_up(n, m):
    return ((n + m - 1) // m) * m


def _pad2d(a, rows, cols, dtype):
    out = jnp.zeros((rows, cols), dtype)
    return out.at[:a.shape[0], :a.shape[1]].set(a.astype(dtype))


def _vmem_capacity_bytes():
    try:
        return int(pltpu.get_tpu_info().vmem_capacity_bytes)
    except Exception:
        return 64 << 20  # conservative fallback = v7x-sized VMEM, safe everywhere


def make_plan(batch, feat_in, feat_out, num_classes):
    """Generation-aware tiling plan (computed once, reused every forward call)."""
    cout0 = _round_up(feat_out, 128)
    nc_p = _round_up(num_classes, 128)
    # Cout tiling: ~1024-wide tiles -> leading parallel axis so v7x's 2 TCs split the
    # conv-weight stream; nj == 1 for small/medium feat_out.
    nj = pl.cdiv(cout0, 1024)
    tcout = _round_up(pl.cdiv(cout0, nj), 128)
    cout_p = tcout * nj

    cin0 = _round_up(feat_in, 128)

    vmem_cap = _vmem_capacity_bytes()
    vmem_limit = min(vmem_cap - (8 << 20), 100 << 20)   # headroom under physical VMEM
    tile_budget = int(vmem_limit * 0.8)                  # room for compiler scratch

    # Resident (single-buffered) bytes + per-tk streamed conv-weight double buffer.
    fixed = (batch * cin0 * 2           # x, bf16, resident
             + 2 * tcout * 4            # gamma/beta, f32
             + tcout * nc_p * 2         # fc weight tile, bf16
             + batch * tcout * 4        # reduce output block, f32
             + batch * nc_p * 4)        # fc partial output block, f32
    per_tk = 2 * tcout * 2              # double-buffered conv-weight tile, bf16
    tk = max(128, ((tile_budget - fixed) // per_tk) // 128 * 128)
    tk = min(tk, cin0)
    cin_p = _round_up(feat_in, tk)
    nk = cin_p // tk

    return dict(feat_in=feat_in, feat_out=feat_out, num_classes=num_classes,
                cin_p=cin_p, cout_p=cout_p, nc_p=nc_p,
                tk=tk, tcout=tcout, nj=nj, nk=nk, vmem_limit=vmem_limit)


def prepare_params(conv_w, bn_gamma, bn_beta, fc_w, plan):
    """One-time weight preprocessing (transpose / zero-pad / bf16 cast), hoisted out of
    the per-call forward path. Zero padding keeps the math exact (padded channels carry
    zero weights/gamma/beta -> zero outputs)."""
    feat_out, feat_in = conv_w.shape[0], conv_w.shape[1]
    w2d = _pad2d(conv_w.reshape(feat_out, feat_in).T,
                 plan["cin_p"], plan["cout_p"], jnp.bfloat16)
    fcw2d = _pad2d(fc_w.T, plan["cout_p"], plan["nc_p"], jnp.bfloat16)
    gb2d = _pad2d(jnp.stack([bn_gamma, bn_beta], axis=0),
                  2, plan["cout_p"], jnp.float32)
    return {"w": w2d, "gb": gb2d, "fcw": fcw2d}


def reduction_fc(x, params, plan):
    """x: (B, feat_in, 1, 1) NCHW. Returns (reduce (B, feat_out), fc (B, num_classes))."""
    B, Cin, H, W = x.shape
    assert H == 1 and W == 1, "ReductionFc requires 1x1 spatial input (post-pooling)"
    assert Cin == plan["feat_in"]
    tk, tcout = plan["tk"], plan["tcout"]
    cin_p, cout_p, nc_p = plan["cin_p"], plan["cout_p"], plan["nc_p"]
    nj, nk = plan["nj"], plan["nk"]

    # Only the activation prep stays in the per-call path (it is tiny).
    x2d = _pad2d(x.reshape(B, Cin), B, cin_p, jnp.bfloat16)

    resident = dict(pipeline_mode=pl.Buffered(1))  # constant-index blocks: 1 buffer
    reduce_p, fc_parts = pl.pallas_call(
        reduction_fc_kernel,
        out_shape=(jax.ShapeDtypeStruct((B, cout_p), jnp.float32),
                   jax.ShapeDtypeStruct((nj, B, nc_p), jnp.float32)),
        grid_spec=pltpu.PrefetchScalarGridSpec(
            num_scalar_prefetch=0,
            grid=(nj, nk),                                     # (Cout tiles, Cin reduction)
            in_specs=[
                pl.BlockSpec((B, cin_p), lambda j, k: (0, 0), **resident),     # x (resident)
                pl.BlockSpec((tk, tcout), lambda j, k: (k, j)),                # conv w (streamed)
                pl.BlockSpec((2, tcout), lambda j, k: (0, j), **resident),     # gamma/beta
                pl.BlockSpec((tcout, nc_p), lambda j, k: (j, 0), **resident),  # fc weight
            ],
            out_specs=[
                pl.BlockSpec((B, tcout), lambda j, k: (0, j), **resident),          # reduce/acc
                pl.BlockSpec((None, B, nc_p), lambda j, k: (j, 0, 0), **resident),  # fc partial
            ],
        ),
        compiler_params=pltpu.CompilerParams(
            dimension_semantics=("parallel", "arbitrary"),   # Cin axis is the reduction
            vmem_limit_bytes=plan["vmem_limit"]),
    )(x2d, params["w"], params["gb"], params["fcw"])

    fc = jnp.sum(fc_parts, axis=0)   # combine per-Cout-tile FC partials (tiny f32 add)
    return reduce_p[:, :plan["feat_out"]], fc[:, :plan["num_classes"]]


def reference(x, conv_w, bn_gamma, bn_beta, fc_w):
    """Pure-JAX reference mirroring the kernel numerics (bf16 matmul operands,
    f32 accumulation, f32 training-mode BN with centered variance)."""
    B, Cin = x.shape[0], x.shape[1]
    Cout = conv_w.shape[0]
    xb = x.reshape(B, Cin).astype(jnp.bfloat16)
    wb = conv_w.reshape(Cout, Cin).astype(jnp.bfloat16)
    y = jnp.dot(xb, wb.T, preferred_element_type=jnp.float32)
    mean = jnp.mean(y, axis=0, keepdims=True)
    d = y - mean
    var = jnp.mean(d * d, axis=0, keepdims=True)
    scale = bn_gamma[None, :].astype(jnp.float32) * jax.lax.rsqrt(var + EPS)
    r = jnp.maximum(d * scale + bn_beta[None, :].astype(jnp.float32), 0.0)
    fc = jnp.dot(r.astype(jnp.bfloat16), fc_w.T.astype(jnp.bfloat16),
                 preferred_element_type=jnp.float32)
    return r, fc


if __name__ == "__main__":
    # Small shapes consistent with the module's forward (1x1 spatial post-pooling).
    B, feat_in, feat_out, num_classes = 2, 32, 16, 8

    key = jax.random.PRNGKey(0)
    k_x, k_conv, k_gamma, k_fc = jax.random.split(key, 4)

    # Deterministic init mirroring the PyTorch _init_* distributions:
    #  conv: kaiming_normal_(fan_in)  -> std = sqrt(2 / feat_in)
    #  bn:   weight ~ N(1, 0.02), bias = 0
    #  fc:   kaiming_normal_(fan_out) -> std = sqrt(2 / num_classes)
    x = jax.random.normal(k_x, (B, feat_in, 1, 1), jnp.float32)
    conv_w = jax.random.normal(k_conv, (feat_out, feat_in, 1, 1), jnp.float32) \
        * jnp.sqrt(2.0 / feat_in)
    bn_gamma = 1.0 + 0.02 * jax.random.normal(k_gamma, (feat_out,), jnp.float32)
    bn_beta = jnp.zeros((feat_out,), jnp.float32)
    fc_w = jax.random.normal(k_fc, (num_classes, feat_out), jnp.float32) \
        * jnp.sqrt(2.0 / num_classes)

    plan = make_plan(B, feat_in, feat_out, num_classes)
    params = prepare_params(conv_w, bn_gamma, bn_beta, fc_w, plan)  # one-time init cost

    reduce_out, fc_out = reduction_fc(x, params, plan)
    jax.block_until_ready((reduce_out, fc_out))

    # bf16 matmul operands shift values by ~1e-2 vs pure f32 (accepted trade-off), so
    # correctness is checked against a reference with mirrored numerics.
    ref_reduce, ref_fc = reference(x, conv_w, bn_gamma, bn_beta, fc_w)
    np.testing.assert_allclose(np.asarray(reduce_out), np.asarray(ref_reduce),
                               rtol=5e-3, atol=5e-3)
    np.testing.assert_allclose(np.asarray(fc_out), np.asarray(ref_fc),
                               rtol=5e-3, atol=5e-3)

    assert reduce_out.shape == (B, feat_out) and fc_out.shape == (B, num_classes)
    print("KERNEL_OK")
</pallas_src>

<mosaic_0001>
module attributes {stable_mosaic.version = 11 : i64} {
  func.func @reduction_fc_kernel(%arg0: i32, %arg1: i32, %arg2: memref<2x128xbf16, #tpu.memory_space<vmem>>, %arg3: memref<128x128xbf16, #tpu.memory_space<vmem>>, %arg4: memref<2x128xf32, #tpu.memory_space<vmem>>, %arg5: memref<128x128xbf16, #tpu.memory_space<vmem>>, %arg6: memref<2x128xf32, #tpu.memory_space<vmem>>, %arg7: memref<1x2x128xf32, #tpu.memory_space<vmem>>) attributes {dimension_semantics = [#tpu.dimension_semantics<parallel>, #tpu.dimension_semantics<arbitrary>], iteration_bounds = array<i64: 1, 1>, scalar_prefetch = 0 : i64, scratch_operands = 0 : i64, tpu.core_type = #tpu.core_type<tc>, window_params = [{pipeline_mode = #tpu.pipeline_mode<synchronous>, transform_indices = @transform_0, window_bounds = array<i64: 2, 128>}, {transform_indices = @transform_1, window_bounds = array<i64: 128, 128>}, {pipeline_mode = #tpu.pipeline_mode<synchronous>, transform_indices = @transform_2, window_bounds = array<i64: 2, 128>}, {pipeline_mode = #tpu.pipeline_mode<synchronous>, transform_indices = @transform_3, window_bounds = array<i64: 128, 128>}, {pipeline_mode = #tpu.pipeline_mode<synchronous>, transform_indices = @transform_4, window_bounds = array<i64: 2, 128>}, {pipeline_mode = #tpu.pipeline_mode<synchronous>, transform_indices = @transform_5, window_bounds = array<i64: 1, 2, 128>}]} {
    %c0_i32 = arith.constant 0 : i32
    %0 = arith.cmpi eq, %arg1, %c0_i32 : i32
    %1 = arith.extui %0 : i1 to i32
    %c0_i32_0 = arith.constant 0 : i32
    %2 = arith.cmpi ne, %1, %c0_i32_0 : i32
    scf.if %2 {
      %cst_9 = arith.constant 0.000000e+00 : f32
      %15 = vector.broadcast %cst_9 : f32 to vector<2x128xf32>
      %c0_10 = arith.constant 0 : index
      %c0_11 = arith.constant 0 : index
      %16 = vector.load %arg6[%c0_10, %c0_11] : memref<2x128xf32, #tpu.memory_space<vmem>>, vector<2x128xf32>
      tpu.vector_store %arg6[%c0_10, %c0_11], %15 {strides = array<i32>} : memref<2x128xf32, #tpu.memory_space<vmem>>, vector<2x128xf32>,
    } else {
    }
    %c128_i32 = arith.constant 128 : i32
    %3 = arith.muli %arg1, %c128_i32 : i32
    %4 = tpu.assume_multiple %3, 128 : i32
    %c0 = arith.constant 0 : index
    %c0_1 = arith.constant 0 : index
    %5 = vector.load %arg6[%c0, %c0_1] : memref<2x128xf32, #tpu.memory_space<vmem>>, vector<2x128xf32>
    %c0_2 = arith.constant 0 : index
    %6 = arith.index_cast %4 : i32 to index
    %7 = vector.load %arg2[%c0_2, %6] : memref<2x128xbf16, #tpu.memory_space<vmem>>, vector<2x128xbf16>
    %c0_3 = arith.constant 0 : index
    %c0_4 = arith.constant 0 : index
    %8 = vector.load %arg3[%c0_3, %c0_4] : memref<128x128xbf16, #tpu.memory_space<vmem>>, vector<128x128xbf16>
    %cst = arith.constant dense<0.000000e+00> : vector<2x128xf32>
    %9 = tpu.matmul %7, %8, %cst {dimension_numbers = #tpu.dot_dimension_numbers<[1], [0], [0], [1], [0, 0, 1, 1], [], []>} : vector<2x128xbf16>, vector<128x128xbf16>, vector<2x128xf32> -> vector<2x128xf32>
    %10 = arith.addf %5, %9 : vector<2x128xf32>
    %c0_5 = arith.constant 0 : index
    %c0_6 = arith.constant 0 : index
    %11 = vector.load %arg6[%c0_5, %c0_6] : memref<2x128xf32, #tpu.memory_space<vmem>>, vector<2x128xf32>
    tpu.vector_store %arg6[%c0_5, %c0_6], %10 {strides = array<i32>} : memref<2x128xf32, #tpu.memory_space<vmem>>, vector<2x128xf32>,
    %c0_i32_7 = arith.constant 0 : i32
    %12 = arith.cmpi eq, %arg1, %c0_i32_7 : i32
    %13 = arith.extui %12 : i1 to i32
    %c0_i32_8 = arith.constant 0 : i32
    %14 = arith.cmpi ne, %13, %c0_i32_8 : i32
    scf.if %14 {
      %c0_9 = arith.constant 0 : index
      %c0_10 = arith.constant 0 : index
      %15 = vector.load %arg6[%c0_9, %c0_10] : memref<2x128xf32, #tpu.memory_space<vmem>>, vector<2x128xf32>
      %cst_11 = arith.constant dense<0.000000e+00> : vector<128xf32>
      %16 = vector.multi_reduction <add>, %15, %cst_11 [0] : vector<2x128xf32> to vector<128xf32>
      %17 = vector.shape_cast %16 : vector<128xf32> to vector<1x128xf32>
      %cst_12 = arith.constant 5.000000e-01 : f32
      %18 = vector.broadcast %cst_12 : f32 to vector<1x128xf32>
      %19 = arith.mulf %17, %18 : vector<1x128xf32>
      %20 = vector.broadcast %19 : vector<1x128xf32> to vector<2x128xf32>
      %21 = arith.subf %15, %20 : vector<2x128xf32>
      %22 = arith.mulf %21, %21 : vector<2x128xf32>
      %cst_13 = arith.constant dense<0.000000e+00> : vector<128xf32>
      %23 = vector.multi_reduction <add>, %22, %cst_13 [0] : vector<2x128xf32> to vector<128xf32>
      %24 = vector.shape_cast %23 : vector<128xf32> to vector<1x128xf32>
      %cst_14 = arith.constant 5.000000e-01 : f32
      %25 = vector.broadcast %cst_14 : f32 to vector<1x128xf32>
      %26 = arith.mulf %24, %25 : vector<1x128xf32>
      %c0_15 = arith.constant 0 : index
      %c0_16 = arith.constant 0 : index
      %27 = vector.load %arg4[%c0_15, %c0_16] : memref<2x128xf32, #tpu.memory_space<vmem>>, vector<1x128xf32>
      %cst_17 = arith.constant 9.99999974E-6 : f32
      %28 = vector.broadcast %cst_17 : f32 to vector<1x128xf32>
      %29 = arith.addf %26, %28 : vector<1x128xf32>
      %30 = math.rsqrt %29 : vector<1x128xf32>
      %31 = arith.mulf %27, %30 : vector<1x128xf32>
      %32 = vector.broadcast %31 : vector<1x128xf32> to vector<2x128xf32>
      %33 = arith.mulf %21, %32 : vector<2x128xf32>
      %c1 = arith.constant 1 : index
      %c0_18 = arith.constant 0 : index
      %34 = vector.load %arg4[%c1, %c0_18] : memref<2x128xf32, #tpu.memory_space<vmem>>, vector<1x128xf32>
      %35 = vector.broadcast %34 : vector<1x128xf32> to vector<2x128xf32>
      %36 = arith.addf %33, %35 : vector<2x128xf32>
      %cst_19 = arith.constant 0.000000e+00 : f32
      %37 = vector.broadcast %cst_19 : f32 to vector<2x128xf32>
      %38 = arith.maximumf %36, %37 : vector<2x128xf32>
      %c0_20 = arith.constant 0 : index
      %c0_21 = arith.constant 0 : index
      %39 = vector.load %arg6[%c0_20, %c0_21] : memref<2x128xf32, #tpu.memory_space<vmem>>, vector<2x128xf32>
      tpu.vector_store %arg6[%c0_20, %c0_21], %38 {strides = array<i32>} : memref<2x128xf32, #tpu.memory_space<vmem>>, vector<2x128xf32>,
      %40 = arith.truncf %38 : vector<2x128xf32> to vector<2x128xbf16>
      %c0_22 = arith.constant 0 : index
      %c0_23 = arith.constant 0 : index
      %41 = vector.load %arg5[%c0_22, %c0_23] : memref<128x128xbf16, #tpu.memory_space<vmem>>, vector<128x128xbf16>
      %cst_24 = arith.constant dense<0.000000e+00> : vector<2x128xf32>
      %42 = tpu.matmul %40, %41, %cst_24 {dimension_numbers = #tpu.dot_dimension_numbers<[1], [0], [0], [1], [0, 0, 1, 1], [], []>} : vector<2x128xbf16>, vector<128x128xbf16>, vector<2x128xf32> -> vector<2x128xf32>
      %c0_25 = arith.constant 0 : index
      %c0_26 = arith.constant 0 : index
      %c0_27 = arith.constant 0 : index
      %43 = vector.load %arg7[%c0_25, %c0_26, %c0_27] : memref<1x2x128xf32, #tpu.memory_space<vmem>>, vector<1x2x128xf32>
      %44 = vector.shape_cast %43 : vector<1x2x128xf32> to vector<2x128xf32>
      %45 = vector.shape_cast %42 : vector<2x128xf32> to vector<1x2x128xf32>
      tpu.vector_store %arg7[%c0_25, %c0_26, %c0_27], %45 {strides = array<i32>} : memref<1x2x128xf32, #tpu.memory_space<vmem>>, vector<1x2x128xf32>,
    } else {
    }
    return
  }
  func.func @transform_0(%arg0: i32, %arg1: i32) -> (i32, i32) {
    %c0_i32 = arith.constant 0 : i32
    %c0_i32_0 = arith.constant 0 : i32
    %c0_i32_1 = arith.constant 0 : i32
    return %c0_i32, %c0_i32_0 : i32, i32
  }
  func.func @transform_1(%arg0: i32, %arg1: i32) -> (i32, i32) {
    %c0_i32 = arith.constant 0 : i32
    return %arg1, %arg0 : i32, i32
  }
  func.func @transform_2(%arg0: i32, %arg1: i32) -> (i32, i32) {
    %c0_i32 = arith.constant 0 : i32
    %c0_i32_0 = arith.constant 0 : i32
    return %c0_i32, %arg0 : i32, i32
  }
  func.func @transform_3(%arg0: i32, %arg1: i32) -> (i32, i32) {
    %c0_i32 = arith.constant 0 : i32
    %c0_i32_0 = arith.constant 0 : i32
    return %arg0, %c0_i32 : i32, i32
  }
  func.func @transform_4(%arg0: i32, %arg1: i32) -> (i32, i32) {
    %c0_i32 = arith.constant 0 : i32
    %c0_i32_0 = arith.constant 0 : i32
    return %c0_i32, %arg0 : i32, i32
  }
  func.func @transform_5(%arg0: i32, %arg1: i32) -> (i32, i32, i32) {
    %c0_i32 = arith.constant 0 : i32
    %c0_i32_0 = arith.constant 0 : i32
    %c0_i32_1 = arith.constant 0 : i32
    return %arg0, %c0_i32, %c0_i32_0 : i32, i32, i32
  }
}

</mosaic_0001>

<bundles_post_ra>
// kernel: tpu_custom_call.1
= control target key start
LH: loop header
LB: loop body
LE: loop exit
PB: predicated region body
PF: predicated region fallthrough
CT: control target
= control target key end

     0   :  { %11 = vsyncpa [#allocation3], 0  ;;  %s631_s0 = inlined_call_operand.hbm [shape: bf16[2,128], index: 0, kind: input, shape index: {}]   ;;  %s632_s1 = inlined_call_operand.hbm [shape: bf16[128,128], index: 1, kind: input, shape index: {}]   ;;  %s633_s2 = inlined_call_operand.hbm [shape: f32[2,128], index: 2, kind: input, shape index: {}]   ;;  %s634_s3 = inlined_call_operand.hbm [shape: bf16[128,128], index: 3, kind: input, shape index: {}]   ;;  %s635_s4 = inlined_call_operand.hbm [shape: f32[2,128], index: 4, kind: output, shape index: {0}]   ;;  %s636_s5 = inlined_call_operand.hbm [shape: f32[1,2,128], index: 5, kind: output, shape index: {1}]  }
   0x1   :  { %12 = vsyncpa [#allocation6], 0 }
   0x2   :  { %13 = vsyncpa [#allocation9], 0 }
   0x3   :  { %14 = vsyncpa [#allocation4], 0  ;;  %s31_s20 = sshll.u32 %s632_s1, 4  ;;  %s32_s20 = int_to_ptr.hbm [resolvable:$true] %s31_s20 }
   0x4   :  { %15 = vsyncpa [#allocation12], 0  ;;  %s574_s21 = smov [#allocation5]   ;;  %s21_s25 = sshll.u32 %s631_s0, 4  ;;  %s22_s25 = int_to_ptr.hbm [resolvable:$true] %s21_s25 }
   0x5   :  { %s33_s22 = sshll.u32 %s574_s21, 4  ;;  %s575_s26 = smov 64   ;;  %s34_s22 = int_to_ptr.vmem [resolvable:$true] %s33_s22 }
   0x6   :  { %s576_s27 = smov 4   ;;  %s577_s28 = smov [#allocation2]  }
   0x7   :  { %39 = dma.hbm_to_vmem [thread:$0]  %s32_s20, 1024, %s34_s22, [#allocation6], %s575_s26, %s575_s26, %s576_s27  }
   0x8   :  { %s23_s29 = sshll.u32 %s577_s28, 4  ;;  %s45_s7 = sshll.u32 %s633_s2, 4  ;;  %s24_s29 = int_to_ptr.vmem [resolvable:$true] %s23_s29  ;;  %s46_s7 = int_to_ptr.hbm [resolvable:$true] %s45_s7 }
   0x9   :  { %26 = dma.hbm_to_vmem [thread:$0]  %s22_s25, 16, %s24_s29, [#allocation3]  }
   0xa   :  { %s55_s9 = sshll.u32 %s634_s3, 4  ;;  %s578_s10 = smov [#allocation7]   ;;  %s56_s9 = int_to_ptr.hbm [resolvable:$true] %s55_s9 }
   0xb   :  { %s47_s11 = sshll.u32 %s578_s10, 4  ;;  %s579_s0 = smov [#allocation8]   ;;  %s48_s11 = int_to_ptr.vmem [resolvable:$true] %s47_s11 }
   0xc   :  { %50 = dma.hbm_to_vmem [thread:$0]  %s46_s7, 32, %s48_s11, [#allocation6]  }
   0xd   :  { %s57_s12 = sshll.u32 %s579_s0, 4  ;;  %s58_s12 = int_to_ptr.vmem [resolvable:$true] %s57_s12 }
   0xe   :  { %63 = dma.hbm_to_vmem [thread:$0]  %s56_s9, 1024, %s58_s12, [#allocation9], %s575_s26, %s575_s26, %s576_s27  }
   0xf   :  { %564 = dma.done.wait [#allocation3], 16  }
  0x10   :  { %565 = vsyncadd [#allocation3], 4294967280 }
  0x11   :  { %566 = dma.done.wait [#allocation6], 1056  }
  0x12   :  { %567 = vsyncadd [#allocation6], 4294966240 }
  0x13   :  { %568 = dma.done.wait [#allocation9], 1024  }
  0x14   :  { %569 = vsyncadd [#allocation9], 4294966272  ;;  %v399_v0 = vld [vmem:[#allocation5 + $0x38] sm:$0xff]  ;;  %v398_v1 = vld [vmem:[#allocation5 + $0x30] sm:$0xff]  ;;  %v580_v2 = vmov 0.0   ;;  %vm174_vm0 = vcmask 1041408  }
  0x15   :  { %155 = vmatpush.bf16.msra.mxu0 %v399_v0  ;;  %84 = vst [vmem:[#allocation10] sm:$0x3] %v580_v2  ;;  %v397_v3 = vld [vmem:[#allocation5 + $0x28] sm:$0xff]  ;;  %v396_v4 = vld [vmem:[#allocation5 + $0x20] sm:$0xff]  ;;  %v395_v5 = vld [vmem:[#allocation5 + $0x18] sm:$0xff]  ;;  %s581_s2 = smov [#allocation10]  }
  0x16   :  { %v394_v6 = vld [vmem:[#allocation5 + $0x10] sm:$0xff]  ;;  %v393_v7 = vld [vmem:[#allocation5 + $0x8] sm:$0xff]  ;;  %v392_v8 = vld [vmem:[#allocation5] sm:$0xff]  ;;  %s297_s3 = sshll.u32 %s581_s2, 4  ;;  %s299_s15 = sshll.u32 %s635_s4, 4  ;;  %s298_s3 = int_to_ptr.vmem [resolvable:$true] %s297_s3  ;;  %s300_s15 = int_to_ptr.hbm [resolvable:$true] %s299_s15 }
  0x17   :  { %v90_v9 = vld [vmem:[#allocation2] sm:$0x1]  ;;  %v406_v11 = vld [vmem:[#allocation8 + $0x30] sm:$0xff]  ;;  %v405_v12 = vld [vmem:[#allocation8 + $0x28] sm:$0xff]  ;;  %s582_s16 = smov [#allocation11]   ;;  %s310_s20 = sshll.u32 %s636_s5, 4  ;;  %s311_s20 = int_to_ptr.hbm [resolvable:$true] %s310_s20 }
  0x18   :  { %v407_v10 = vld [vmem:[#allocation8 + $0x38] sm:$0xff]  ;;  %v404_v13 = vld [vmem:[#allocation8 + $0x20] sm:$0xff]  ;;  %v402_v15 = vld [vmem:[#allocation8 + $0x10] sm:$0xff]  ;;  %s308_s17 = sshll.u32 %s582_s16, 4  ;;  %s309_s17 = int_to_ptr.vmem [resolvable:$true] %s308_s17 }
  0x19   :  { %156 = vmatpush.bf16.msra.mxu0 %v398_v1  ;;  %278 = vmatpush.bf16.msra.mxu1 %v407_v10  ;;  %v403_v14 = vld [vmem:[#allocation8 + $0x18] sm:$0xff]  ;;  %v401_v17 = vld [vmem:[#allocation8 + $0x8] sm:$0xff]  ;;  %v400_v20 = vld [vmem:[#allocation8] sm:$0xff] }
  0x1a   :  { %v193_v47 = vld [vmem:[#allocation7] sm:$0x1]  ;;  %v417_v52 = vld [vmem:[#allocation7 + $0x1] ss:$0 sm:$0xff] }
  0x1c   :  { %v86_v16 = vld [vmem:[#allocation10] sm:$0x3] }
  0x1d   :  { %157 = vmatpush.bf16.msra.mxu0 %v397_v3  ;;  %279 = vmatpush.bf16.msra.mxu1 %v406_v11 }
  0x21   :  { %158 = vmatpush.bf16.msra.mxu0 %v396_v4  ;;  %280 = vmatpush.bf16.msra.mxu1 %v405_v12 }
  0x25   :  { %159 = vmatpush.bf16.msra.mxu0 %v395_v5  ;;  %281 = vmatpush.bf16.msra.mxu1 %v404_v13 }
  0x29   :  { %160 = vmatpush.bf16.msra.mxu0 %v394_v6  ;;  %282 = vmatpush.bf16.msra.mxu1 %v403_v14 }
  0x2d   :  { %161 = vmatpush.bf16.msra.mxu0 %v393_v7  ;;  %283 = vmatpush.bf16.msra.mxu1 %v402_v15 }
  0x31   :  { %162 = vmatpush.bf16.msra.mxu0 %v392_v8  ;;  %284 = vmatpush.bf16.msra.mxu1 %v401_v17 }
  0x34   :  { %163 = vmatmul.bf16.vlgmr.msra.gmra.mxu0 %v90_v9 }
  0x35   :  { %285 = vmatpush.bf16.msra.mxu1 %v400_v20 }
  0xb1   :  { %v164_v18 = vpop.f32.mrf.mxu0 }
  0xb2   :  { %v168_v19 = vadd.f32 %v164_v18, %v86_v16 }
  0xb4   :  { %169 = vst [vmem:[#allocation10] sm:$0x3] %v168_v19 }
  0xb9   :  { %v166_v21 = vpop.f32.mrf.mxu0 }
  0xbb   :  { %v173_v22 = vld [vmem:[#allocation10] sm:$0x3] }
  0xbc   :  { %v175_v23 = vsel %vm174_vm0, %v173_v22, 0.0 }
  0xbd   :  { %v176_v24 = vrot.slane %v175_v23, 4 }
  0xbf   :  { %v177_v25 = vadd.f32 %v176_v24, %v175_v23 }
  0xc1   :  { %v178_v26 = vrot.slane %v177_v25, 2 }
  0xc3   :  { %v179_v27 = vadd.f32 %v178_v26, %v177_v25 }
  0xc5   :  { %v180_v28 = vrot.slane %v179_v27, 1 }
  0xc7   :  { %v181_v29 = vadd.f32 %v180_v28, %v179_v27 }
  0xc9   :  { %v182_v30 = vmul.f32 0.5, %v181_v29 }
  0xcb   :  { %v183_v31 = vsub.f32 %v173_v22, %v182_v30 }
  0xcd   :  { %v184_v32 = vmul.f32 %v183_v31, %v183_v31 }
  0xcf   :  { %v185_v33 = vsel %vm174_vm0, %v184_v32, 0.0 }
  0xd0   :  { %v186_v34 = vrot.slane %v185_v33, 4 }
  0xd2   :  { %v187_v35 = vadd.f32 %v186_v34, %v185_v33 }
  0xd4   :  { %v188_v36 = vrot.slane %v187_v35, 2 }
  0xd6   :  { %v189_v37 = vadd.f32 %v188_v36, %v187_v35 }
  0xd8   :  { %v190_v38 = vrot.slane %v189_v37, 1 }
  0xda   :  { %v191_v39 = vadd.f32 %v190_v38, %v189_v37 }
  0xdc   :  { %v192_v40 = vmul.f32 0.5, %v191_v39 }
  0xde   :  { %v194_v41 = vadd.f32 1e-05, %v192_v40 }
  0xe0   :  { %418 = vrsqrt.f32 %v194_v41  ;;  %vm201_vm2 = vweird.f32 %v194_v41 }
  0xe6   :  { %v419_v42 = vpop.eup %418 }
  0xe7   :  { %v196_v43 = vmul.f32 %v419_v42, %v194_v41  ;;  %vm202_vm1 = vweird.f32 %v419_v42 }
  0xe8   :  { %vm203_vm3 = vmor %vm201_vm2, %vm202_vm1 }
  0xe9   :  { %v197_v44 = vmul.f32 %v419_v42, %v196_v43 }
  0xeb   :  { %v198_v45 = vmul.f32 0.5, %v197_v44 }
  0xed   :  { %v199_v46 = vsub.f32 1.5, %v198_v45 }
  0xef   :  { %v200_v48 = vmul.f32 %v419_v42, %v199_v46 }
  0xf1   :  { %v204_v49 = vsel %vm203_vm3, %v419_v42, %v200_v48 }
  0xf2   :  { %v205_v50 = vmul.f32 %v204_v49, %v193_v47 }
  0xf4   :  { %v206_v51 = vperm.slane %v205_v50, 0 }
  0xf6   :  { %v207_v53 = vmul.f32 %v206_v51, %v183_v31 }
  0xf8   :  { %v210_v54 = vadd.f32 %v417_v52, %v207_v53 }
  0xfa   :  { %v211_v55 = vmax.f32 %v210_v54, 0.0 }
  0xfc   :  { %v213_v56 = vpack.c.bf16 %v211_v55, %v211_v55  ;;  %212 = vst [vmem:[#allocation10] sm:$0x3] %v211_v55 }
  0xfd   :  { %302 = dma.vmem_to_hbm [thread:$0]  %s298_s3, 32, %s300_s15, [#allocation4]  }
  0xfe   :  { %286 = vmatmul.bf16.vlgmr.msra.gmra.mxu1 %v213_v56 }
 0x17b   :  { %v287_v57 = vpop.f32.mrf.mxu1 }
 0x17c   :  { %291 = vst [vmem:[#allocation11] sm:$0x3] %v287_v57 }
 0x17d   :  { %313 = dma.vmem_to_hbm [thread:$0]  %s309_s17, 32, %s311_s20, [#allocation12]  }
 0x183   :  { %v289_v58 = vpop.f32.mrf.mxu1 }
 0x184   :  { %570 = dma.done.wait [#allocation4], 32  }
 0x185   :  { %571 = vsyncadd [#allocation4], 4294967264 }
 0x186   :  { %572 = dma.done.wait [#allocation12], 32  }
 0x187   :  { %573 = vsyncadd [#allocation12], 4294967264 }
 0x188   :  { %322 = vsyncpa [#allocation3], 1 }
 0x189   :  { %323 = vsyncpa [#allocation6], 1 }
 0x18a   :  { %324 = vsyncpa [#allocation9], 1 }
 0x18b   :  { %325 = vsyncpa [#allocation4], 1 }
 0x18c   :  { %326 = vsyncpa [#allocation12], 1 }

</bundles_post_ra>
